<compile_context>
chip_gen: v5e
topology: v5e:2x2
jax: 0.10.0
libtpu: 0.0.40
codegen_flags: <defaults>
</compile_context>

<pallas_src>
import numpy as np

import jax
import jax.numpy as jnp
from jax.experimental import pallas as pl
from jax.experimental.pallas import tpu as pltpu

_LANES = 128
_ROW_ALIGN = 32                     # row multiple valid for f32/bf16/int8 tilings
_MAX_TILE_BYTES = 8 * 1024 * 1024   # per output buffer (Pallas double-buffers it)
_TARGET_GRID_STEPS = 8              # amortize per-step overhead, feed both v7x TCs


def _cdiv(a: int, b: int) -> int:
    return (a + b - 1) // b


def _round_up(a: int, b: int) -> int:
    return _cdiv(a, b) * b


def _pseudo_class_embed_kernel(pattern_ref, o_ref):
    # pattern_ref: (1, W) row holding 128 periods of [1]*num_classes + [0].
    # Every output row of the lane-dense view carries the identical pattern,
    # so the body is a sublane broadcast + full-128-lane stores: no index
    # math, no masked partial stores.
    o_ref[...] = jnp.broadcast_to(pattern_ref[...], o_ref.shape)


def pseudo_class_embed(x: jax.Array, num_classes: int) -> jax.Array:
    """JAX/Pallas equivalent of PseudoClassEmbed(num_classes)(x)."""
    *lead, _d = x.shape
    m = 1
    for s in lead:
        m *= s
    c_out = num_classes + 1
    dtype = x.dtype

    # Degenerate case: empty leading extent -> empty result, no pallas_call.
    if m == 0:
        return jnp.zeros((*lead, c_out), dtype=dtype)

    itemsize = jnp.dtype(dtype).itemsize
    total = m * c_out

    # Lane-dense flat view: width W = c_out * 128 holds exactly 128 periods of
    # the class pattern, so the 2-D view (rows, W) has identical rows.
    w = c_out * _LANES
    rows = _cdiv(m, _LANES)

    # Row tile: a handful of large, 32-aligned tiles capped by the VMEM budget.
    tr = _round_up(max(1, _cdiv(rows, _TARGET_GRID_STEPS)), _ROW_ALIGN)
    max_tr = max(
        _ROW_ALIGN,
        (_MAX_TILE_BYTES // (w * itemsize)) // _ROW_ALIGN * _ROW_ALIGN,
    )
    tr = min(tr, max_tr)
    n_steps = _cdiv(rows, tr)
    # v7x megacore: guarantee >= 2 grid steps whenever there is more than one
    # tile's worth of rows so both TensorCores get work.
    if n_steps == 1 and rows > _ROW_ALIGN:
        tr = _round_up(_cdiv(rows, 2), _ROW_ALIGN)
        n_steps = _cdiv(rows, tr)

    # VMEM budget: double-buffered output tile + (tiny) pattern row + slack.
    # Raise the scoped limit explicitly so 8 MiB tiles also compile on v5e
    # (16 MiB scoped default); cap at v7x's 64 MiB physical VMEM.
    tile_bytes = tr * w * itemsize
    pattern_bytes = w * itemsize
    vmem_need = 2 * tile_bytes + 2 * pattern_bytes + (2 << 20)
    vmem_limit = int(min(64 << 20, max(32 << 20, vmem_need)))

    # Compile-time constant pattern row: 128 periods of [1]*num_classes + [0].
    pattern = jnp.asarray(
        (np.arange(w) % c_out) < num_classes, dtype=dtype
    ).reshape(1, w)

    out2d = pl.pallas_call(
        _pseudo_class_embed_kernel,
        # Exact shape: no padded rows, so no full-array slice copy afterwards.
        out_shape=jax.ShapeDtypeStruct((rows, w), dtype),
        grid_spec=pltpu.PrefetchScalarGridSpec(
            num_scalar_prefetch=0,
            grid=(n_steps,),
            in_specs=[pl.BlockSpec((1, w), lambda i: (0, 0))],
            out_specs=pl.BlockSpec((tr, w), lambda i: (i, 0)),
        ),
        compiler_params=pltpu.CompilerParams(
            dimension_semantics=("parallel",),
            vmem_limit_bytes=vmem_limit,
        ),
        cost_estimate=pl.CostEstimate(
            flops=0,
            transcendentals=0,
            bytes_accessed=rows * w * itemsize + pattern_bytes,
        ),
    )(pattern)

    if total == rows * w:
        # m % 128 == 0: the lane-dense view is exactly the logical output.
        return out2d.reshape(*lead, c_out)
    # Otherwise drop the (< one row of) flat padding from the exact-shape
    # output and restore the logical shape.
    return out2d.reshape(-1)[:total].reshape(*lead, c_out)


if __name__ == "__main__":
    key = jax.random.PRNGKey(0)
    batch, seq, hidden = 2, 8, 32
    num_classes = 8

    x = jax.random.normal(key, (batch, seq, hidden), dtype=jnp.float32)

    logits = jax.block_until_ready(pseudo_class_embed(x, num_classes))

    expected = jnp.concatenate(
        [
            jnp.ones((batch, seq, num_classes), dtype=jnp.float32),
            jnp.zeros((batch, seq, 1), dtype=jnp.float32),
        ],
        axis=-1,
    )
    assert logits.shape == (batch, seq, num_classes + 1), logits.shape
    assert logits.dtype == x.dtype, logits.dtype
    assert bool(jnp.all(logits == expected)), "mismatch vs reference (f32)"

    # dtype robustness (bf16 path uses the same lane-dense layout).
    xb = x.astype(jnp.bfloat16)
    logits_b = jax.block_until_ready(pseudo_class_embed(xb, num_classes))
    assert logits_b.dtype == jnp.bfloat16, logits_b.dtype
    assert bool(jnp.all(logits_b.astype(jnp.float32) == expected)), "mismatch (bf16)"

    # m % 128 == 0 fast path: no wrapper slice at all (4*32 = 128 rows).
    x2 = jnp.zeros((4, 32, hidden), dtype=jnp.float32)
    logits2 = jax.block_until_ready(pseudo_class_embed(x2, num_classes))
    e2 = jnp.concatenate(
        [jnp.ones((4, 32, num_classes), jnp.float32),
         jnp.zeros((4, 32, 1), jnp.float32)],
        axis=-1,
    )
    assert logits2.shape == (4, 32, num_classes + 1), logits2.shape
    assert bool(jnp.all(logits2 == e2)), "mismatch (exact-shape fast path)"

    # Multi-step grid with a ragged last output block (40 rows, tile = 32).
    x3 = jnp.zeros((40, 128, hidden), dtype=jnp.float32)
    logits3 = jax.block_until_ready(pseudo_class_embed(x3, num_classes))
    e3 = jnp.concatenate(
        [jnp.ones((40, 128, num_classes), jnp.float32),
         jnp.zeros((40, 128, 1), jnp.float32)],
        axis=-1,
    )
    assert logits3.shape == (40, 128, num_classes + 1), logits3.shape
    assert bool(jnp.all(logits3 == e3)), "mismatch (ragged last block)"

    print("KERNEL_OK")
</pallas_src>

<mosaic_0001>
module attributes {stable_mosaic.version = 11 : i64} {
  func.func @_pseudo_class_embed_kernel(%arg0: i32, %arg1: memref<1x1152xf32, #tpu.memory_space<vmem>>, %arg2: memref<32x1152xf32, #tpu.memory_space<vmem>>) attributes {dimension_semantics = [#tpu.dimension_semantics<parallel>], iteration_bounds = array<i64: 1>, scalar_prefetch = 0 : i64, scratch_operands = 0 : i64, tpu.core_type = #tpu.core_type<tc>, window_params = [{pipeline_mode = #tpu.pipeline_mode<synchronous>, transform_indices = @transform_0, window_bounds = array<i64: 1, 1152>}, {transform_indices = @transform_1, window_bounds = array<i64: 32, 1152>}]} {
    %c0 = arith.constant 0 : index
    %c0_0 = arith.constant 0 : index
    %0 = vector.load %arg1[%c0, %c0_0] : memref<1x1152xf32, #tpu.memory_space<vmem>>, vector<1x1152xf32>
    %1 = vector.shape_cast %0 : vector<1x1152xf32> to vector<1x1152xf32>
    %2 = vector.broadcast %1 : vector<1x1152xf32> to vector<32x1152xf32>
    %c0_1 = arith.constant 0 : index
    %c0_2 = arith.constant 0 : index
    %3 = vector.load %arg2[%c0_1, %c0_2] : memref<32x1152xf32, #tpu.memory_space<vmem>>, vector<32x1152xf32>
    tpu.vector_store %arg2[%c0_1, %c0_2], %2 {strides = array<i32>} : memref<32x1152xf32, #tpu.memory_space<vmem>>, vector<32x1152xf32>,
    return
  }
  func.func @transform_0(%arg0: i32) -> (i32, i32) {
    %c0_i32 = arith.constant 0 : i32
    %c0_i32_0 = arith.constant 0 : i32
    %c0_i32_1 = arith.constant 0 : i32
    return %c0_i32, %c0_i32_0 : i32, i32
  }
  func.func @transform_1(%arg0: i32) -> (i32, i32) {
    %c0_i32 = arith.constant 0 : i32
    %c0_i32_0 = arith.constant 0 : i32
    return %arg0, %c0_i32 : i32, i32
  }
}

</mosaic_0001>

<bundles_post_ra>
// kernel: tpu_custom_call.1
= control target key start
LH: loop header
LB: loop body
LE: loop exit
PB: predicated region body
PF: predicated region fallthrough
CT: control target
= control target key end

     0   :  { %6 = vsyncpa [#allocation3], 0  ;;  %s530_s0 = inlined_call_operand.hbm [shape: f32[1,1152], index: 0, kind: input, shape index: {}]   ;;  %s531_s1 = inlined_call_operand.hbm [shape: f32[1,1152], index: 1, kind: output, shape index: {}]  }
   0x1   :  { %7 = vsyncpa [#allocation4], 0  ;;  %s13_s8 = sshll.u32 %s530_s0, 4  ;;  %s293_s9 = smov [#allocation2]   ;;  %s14_s8 = int_to_ptr.hbm [resolvable:$true] %s13_s8 }
   0x2   :  { %s15_s10 = sshll.u32 %s293_s9, 4  ;;  %s16_s10 = int_to_ptr.vmem [resolvable:$true] %s15_s10 }
   0x3   :  { %18 = dma.hbm_to_vmem [thread:$0]  %s14_s8, 144, %s16_s10, [#allocation3]  }
   0x4   :  { %289 = dma.done.wait [#allocation3], 144  }
   0x5   :  { %290 = vsyncadd [#allocation3], 4294967152  ;;  %v150_v0 = vlaneseq  ;;  %vm46_vm1 = vcmask 1042434   ;;  %vm48_vm2 = vcmask 1041408   ;;  %vm52_vm4 = vcmask 1046534   ;;  %v23_v2 = vld [vmem:[#allocation2] sm:$0xff] }
   0x6   :  { %vm58_vm5 = vcmask 1041409   ;;  %vm60_vm6 = vcmask 1043459   ;;  %vm54_vm7 = vcmask 1045508   ;;  %vm532_vm9 = vcmask 1042433   ;;  %v314_v3 = vld [vmem:[#allocation2 + $0x8] ss:$0 sm:$0xff] }
   0x7   :  { %vm310_vm8 = vcmp.lt.s32.totalorder %v150_v0, 128  ;;  %vm64_vm10 = vcmask 1045509   ;;  %vm66_vm11 = vcmask 1046528   ;;  %vm534_vm12 = vcmask 1043456  }
   0x8   :  { %vm533_vm13 = vcmask 1046533   ;;  %vm70_vm14 = vcmask 1044481   ;;  %vm76_vm15 = vcmask 1043458   ;;  %vm80_vm0 = vcmask 1045504   ;;  %154 = vst.msk [vmem:[#allocation5 + $0x8] sm:$0x1] %vm310_vm8, %v314_v3 }
   0x9   :  { %v316_v4 = vperm.slane %v23_v2, 0  ;;  %v28_v5 = vperm.slane %v23_v2, 1  ;;  %v29_v6 = vperm.slane %v23_v2, 2  ;;  %v30_v7 = vperm.slane %v23_v2, 3  ;;  %170 = vst.msk [vmem:[#allocation5 + $0x50] sm:$0x1] %vm310_vm8, %v314_v3 }
   0xa   :  { %v31_v8 = vperm.slane %v23_v2, 4  ;;  %v32_v9 = vperm.slane %v23_v2, 5  ;;  %v33_v10 = vperm.slane %v23_v2, 6  ;;  %v34_v11 = vperm.slane %v23_v2, 7  ;;  %186 = vst.msk [vmem:[#allocation5 + $0x98] sm:$0x1] %vm310_vm8, %v314_v3 }
   0xb   :  { %v321_v12 = vrot.slane %v28_v5, 7  ;;  %v323_v13 = vrot.slane %v29_v6, 6  ;;  %v325_v14 = vrot.slane %v30_v7, 5  ;;  %v73_v15 = vrot.slane %v314_v3, 1  ;;  %202 = vst.msk [vmem:[#allocation5 + $0xe0] sm:$0x1] %vm310_vm8, %v314_v3 }
   0xc   :  { %v331_v16 = vrot.slane %v31_v8, 4  ;;  %v333_v17 = vrot.slane %v32_v9, 3  ;;  %v335_v18 = vrot.slane %v33_v10, 2  ;;  %v337_v19 = vrot.slane %v34_v11, 1 }
   0xd   :  { %vm538_vm3 = vcmask 1040384   ;;  %v47_v21 = vsel %vm46_vm1, %v323_v13, %v325_v14  ;;  %v59_v22 = vsel %vm58_vm5, %v316_v4, %v321_v12  ;;  %v61_v23 = vsel %vm60_vm6, %v323_v13, %v325_v14  ;;  %156 = vst.msk [vmem:[#allocation5 + $0x11] sm:$0x1] %vm310_vm8, %v73_v15 }
   0xe   :  { %v45_v20 = vsel %vm538_vm3, %v316_v4, %v321_v12  ;;  %vm539_vm3 = vcmask 1044484   ;;  %v53_v26 = vsel %vm52_vm4, %v335_v18, %v337_v19  ;;  %v63_v27 = vsel %vm532_vm9, %v59_v22, %v61_v23  ;;  %172 = vst.msk [vmem:[#allocation5 + $0x59] sm:$0x1] %vm310_vm8, %v73_v15 }
   0xf   :  { %v49_v24 = vsel %vm48_vm2, %v45_v20, %v47_v21  ;;  %v51_v25 = vsel %vm539_vm3, %v331_v16, %v333_v17  ;;  %v65_v29 = vsel %vm64_vm10, %v331_v16, %v333_v17  ;;  %v67_v30 = vsel %vm66_vm11, %v337_v19, %v335_v18  ;;  %188 = vst.msk [vmem:[#allocation5 + $0xa1] sm:$0x1] %vm310_vm8, %v73_v15 }
  0x10   :  { %v55_v28 = vsel %vm54_vm7, %v51_v25, %v53_v26  ;;  %v74_v31 = vsel %vm46_vm1, %v316_v4, %v321_v12  ;;  %v69_v33 = vsel %vm533_vm13, %v65_v29, %v67_v30  ;;  %v75_v34 = vsel %vm539_vm3, %v323_v13, %v325_v14  ;;  %204 = vst.msk [vmem:[#allocation5 + $0xe9] sm:$0x1] %vm310_vm8, %v73_v15 }
  0x11   :  { %v57_v32 = vsel %vm534_vm12, %v49_v24, %v55_v28  ;;  %v78_v35 = vsel %vm52_vm4, %v331_v16, %v333_v17  ;;  %v71_v36 = vsel %vm70_vm14, %v63_v27, %v69_v33  ;;  %v77_v37 = vsel %vm76_vm15, %v74_v31, %v75_v34 }
  0x12   :  { %149 = vst [vmem:[#allocation5] sm:$0xff] %v57_v32  ;;  %vm540_vm9 = vcmask 1040384   ;;  %v72_v39 = vrot.slane %v71_v36, 1  ;;  %vm541_vm13 = vcmask 1045506   ;;  %vm535_vm3 = vcmask 1044483  }
  0x13   :  { %v79_v38 = vsel %vm540_vm9, %v335_v18, %v337_v19  ;;  %169 = vst [vmem:[#allocation5 + $0x48] sm:$0xff] %v57_v32  ;;  %vm92_vm12 = vcmask 1046529   ;;  %v86_v42 = vsel %vm60_vm6, %v316_v4, %v321_v12  ;;  %v87_v43 = vsel %vm64_vm10, %v323_v13, %v325_v14 }
  0x14   :  { %v81_v40 = vsel %vm80_vm0, %v79_v38, %v78_v35  ;;  %185 = vst [vmem:[#allocation5 + $0x90] sm:$0xff] %v57_v32  ;;  %v90_v44 = vsel %vm66_vm11, %v333_v17, %v331_v16  ;;  %v91_v45 = vsel %vm58_vm5, %v335_v18, %v337_v19  ;;  %v89_v47 = vsel %vm535_vm3, %v86_v42, %v87_v43 }
  0x15   :  { %v83_v41 = vsel %vm541_vm13, %v77_v37, %v81_v40  ;;  %201 = vst [vmem:[#allocation5 + $0xd8] sm:$0xff] %v57_v32  ;;  %v93_v48 = vsel %vm92_vm12, %v91_v45, %v90_v44  ;;  %vm94_vm9 = vcmask 1046531   ;;  %v85_v49 = vrot.slane %v314_v3, 2 }
  0x16   :  { %155 = vst [vmem:[#allocation5 + $0x9] sm:$0xff] %v72_v39  ;;  %v84_v46 = vrot.slane %v83_v41, 2  ;;  %v95_v50 = vsel %vm94_vm9, %v89_v47, %v93_v48  ;;  %vm542_vm13 = vcmask 1044484   ;;  %v99_v52 = vsel %vm52_vm4, %v323_v13, %v325_v14 }
  0x17   :  { %171 = vst [vmem:[#allocation5 + $0x51] sm:$0xff] %v72_v39  ;;  %v98_v51 = vsel %vm542_vm13, %v316_v4, %v321_v12  ;;  %vm543_vm3 = vcmask 1040384   ;;  %v102_v54 = vsel %vm46_vm1, %v335_v18, %v337_v19  ;;  %v96_v55 = vrot.slane %v95_v50, 3 }
  0x18   :  { %187 = vst [vmem:[#allocation5 + $0x99] sm:$0xff] %v72_v39  ;;  %v101_v53 = vsel %vm543_vm3, %v331_v16, %v333_v17  ;;  %v100_v56 = vsel %vm54_vm7, %v98_v51, %v99_v52  ;;  %v97_v58 = vrot.slane %v314_v3, 3  ;;  %vm544_vm3 = vcmask 1043456  }
  0x19   :  { %203 = vst [vmem:[#allocation5 + $0xe1] sm:$0xff] %v72_v39  ;;  %v103_v57 = vsel %vm48_vm2, %v101_v53, %v102_v54  ;;  %v107_v60 = vsel %vm64_vm10, %v316_v4, %v321_v12  ;;  %v108_v61 = vsel %vm66_vm11, %v325_v14, %v323_v13  ;;  %v110_v62 = vsel %vm58_vm5, %v331_v16, %v333_v17 }
  0x1a   :  { %157 = vst [vmem:[#allocation5 + $0x12] sm:$0xff] %v84_v46  ;;  %v104_v59 = vsel %vm544_vm3, %v103_v57, %v100_v56  ;;  %v111_v63 = vsel %vm60_vm6, %v335_v18, %v337_v19  ;;  %vm545_vm2 = vcmask 1046533   ;;  %vm546_vm7 = vcmask 1042433  }
  0x1b   :  { %173 = vst [vmem:[#allocation5 + $0x5a] sm:$0xff] %v84_v46  ;;  %v105_v0 = vrot.slane %v104_v59, 4  ;;  %v109_v2 = vsel %vm545_vm2, %v107_v60, %v108_v61  ;;  %v112_v5 = vsel %vm546_vm7, %v110_v62, %v111_v63  ;;  %v106_v6 = vrot.slane %v314_v3, 4 }
  0x1c   :  { %189 = vst [vmem:[#allocation5 + $0xa2] sm:$0xff] %v84_v46  ;;  %v113_v7 = vsel %vm70_vm14, %v112_v5, %v109_v2  ;;  %v116_v8 = vsel %vm52_vm4, %v316_v4, %v321_v12  ;;  %vm547_vm13 = vcmask 1040384   ;;  %v119_v10 = vsel %vm46_vm1, %v331_v16, %v333_v17 }
  0x1d   :  { %205 = vst [vmem:[#allocation5 + $0xea] sm:$0xff] %v84_v46  ;;  %v117_v9 = vsel %vm547_vm13, %v323_v13, %v325_v14  ;;  %vm548_vm3 = vcmask 1044484   ;;  %v114_v15 = vrot.slane %v113_v7, 5  ;;  %v115_v22 = vrot.slane %v314_v3, 5 }
  0x1e   :  { %158 = vst.msk [vmem:[#allocation5 + $0x1a] sm:$0x1] %vm310_vm8, %v85_v49  ;;  %v120_v11 = vsel %vm548_vm3, %v335_v18, %v337_v19  ;;  %v118_v20 = vsel %vm80_vm0, %v117_v9, %v116_v8  ;;  %vm549_vm1 = vcmask 1045506   ;;  %v125_v24 = vsel %vm66_vm11, %v321_v12, %v316_v4 }
  0x1f   :  { %174 = vst.msk [vmem:[#allocation5 + $0x62] sm:$0x1] %vm310_vm8, %v85_v49  ;;  %v121_v21 = vsel %vm76_vm15, %v119_v10, %v120_v11  ;;  %v126_v25 = vsel %vm58_vm5, %v323_v13, %v325_v14  ;;  %v128_v26 = vsel %vm60_vm6, %v331_v16, %v333_v17  ;;  %v129_v27 = vsel %vm64_vm10, %v335_v18, %v337_v19 }
  0x20   :  { %190 = vst.msk [vmem:[#allocation5 + $0xaa] sm:$0x1] %vm310_vm8, %v85_v49  ;;  %v122_v23 = vsel %vm549_vm1, %v121_v21, %v118_v20  ;;  %v127_v4 = vsel %vm92_vm12, %v126_v25, %v125_v24  ;;  %vm550_vm0 = vcmask 1044483   ;;  %v124_v13 = vrot.slane %v314_v3, 6 }
  0x21   :  { %206 = vst.msk [vmem:[#allocation5 + $0xf2] sm:$0x1] %vm310_vm8, %v85_v49  ;;  %v123_v28 = vrot.slane %v122_v23, 6  ;;  %v130_v12 = vsel %vm550_vm0, %v128_v26, %v129_v27  ;;  %v133_v17 = vrot.slane %v314_v3, 7 }
  0x22   :  { %159 = vst [vmem:[#allocation5 + $0x1b] sm:$0xff] %v96_v55  ;;  %v131_v14 = vsel %vm94_vm9, %v130_v12, %v127_v4 }
  0x23   :  { %175 = vst [vmem:[#allocation5 + $0x63] sm:$0xff] %v96_v55  ;;  %v132_v16 = vrot.slane %v131_v14, 7 }
  0x24   :  { %191 = vst [vmem:[#allocation5 + $0xab] sm:$0xff] %v96_v55 }
  0x25   :  { %207 = vst [vmem:[#allocation5 + $0xf3] sm:$0xff] %v96_v55 }
  0x26   :  { %160 = vst.msk [vmem:[#allocation5 + $0x23] sm:$0x1] %vm310_vm8, %v97_v58 }
  0x27   :  { %176 = vst.msk [vmem:[#allocation5 + $0x6b] sm:$0x1] %vm310_vm8, %v97_v58 }
  0x28   :  { %192 = vst.msk [vmem:[#allocation5 + $0xb3] sm:$0x1] %vm310_vm8, %v97_v58 }
  0x29   :  { %208 = vst.msk [vmem:[#allocation5 + $0xfb] sm:$0x1] %vm310_vm8, %v97_v58 }
  0x2a   :  { %161 = vst [vmem:[#allocation5 + $0x24] sm:$0xff] %v105_v0 }
  0x2b   :  { %177 = vst [vmem:[#allocation5 + $0x6c] sm:$0xff] %v105_v0 }
  0x2c   :  { %193 = vst [vmem:[#allocation5 + $0xb4] sm:$0xff] %v105_v0 }
  0x2d   :  { %209 = vst [vmem:[#allocation5 + $0xfc] sm:$0xff] %v105_v0 }
  0x2e   :  { %162 = vst.msk [vmem:[#allocation5 + $0x2c] sm:$0x1] %vm310_vm8, %v106_v6 }
  0x2f   :  { %178 = vst.msk [vmem:[#allocation5 + $0x74] sm:$0x1] %vm310_vm8, %v106_v6 }
  0x30   :  { %194 = vst.msk [vmem:[#allocation5 + $0xbc] sm:$0x1] %vm310_vm8, %v106_v6 }
  0x31   :  { %210 = vst.msk [vmem:[#allocation5 + $0x104] sm:$0x1] %vm310_vm8, %v106_v6 }
  0x32   :  { %163 = vst [vmem:[#allocation5 + $0x2d] sm:$0xff] %v114_v15 }
  0x33   :  { %179 = vst [vmem:[#allocation5 + $0x75] sm:$0xff] %v114_v15 }
  0x34   :  { %195 = vst [vmem:[#allocation5 + $0xbd] sm:$0xff] %v114_v15 }
  0x35   :  { %211 = vst [vmem:[#allocation5 + $0x105] sm:$0xff] %v114_v15 }
  0x36   :  { %164 = vst.msk [vmem:[#allocation5 + $0x35] sm:$0x1] %vm310_vm8, %v115_v22 }
  0x37   :  { %180 = vst.msk [vmem:[#allocation5 + $0x7d] sm:$0x1] %vm310_vm8, %v115_v22 }
  0x38   :  { %196 = vst.msk [vmem:[#allocation5 + $0xc5] sm:$0x1] %vm310_vm8, %v115_v22 }
  0x39   :  { %212 = vst.msk [vmem:[#allocation5 + $0x10d] sm:$0x1] %vm310_vm8, %v115_v22 }
  0x3a   :  { %165 = vst [vmem:[#allocation5 + $0x36] sm:$0xff] %v123_v28 }
  0x3b   :  { %181 = vst [vmem:[#allocation5 + $0x7e] sm:$0xff] %v123_v28 }
  0x3c   :  { %197 = vst [vmem:[#allocation5 + $0xc6] sm:$0xff] %v123_v28 }
  0x3d   :  { %213 = vst [vmem:[#allocation5 + $0x10e] sm:$0xff] %v123_v28 }
  0x3e   :  { %166 = vst.msk [vmem:[#allocation5 + $0x3e] sm:$0x1] %vm310_vm8, %v124_v13 }
  0x3f   :  { %182 = vst.msk [vmem:[#allocation5 + $0x86] sm:$0x1] %vm310_vm8, %v124_v13 }
  0x40   :  { %198 = vst.msk [vmem:[#allocation5 + $0xce] sm:$0x1] %vm310_vm8, %v124_v13 }
  0x41   :  { %214 = vst.msk [vmem:[#allocation5 + $0x116] sm:$0x1] %vm310_vm8, %v124_v13 }
  0x42   :  { %167 = vst [vmem:[#allocation5 + $0x3f] sm:$0xff] %v132_v16 }
  0x43   :  { %183 = vst [vmem:[#allocation5 + $0x87] sm:$0xff] %v132_v16 }
  0x44   :  { %199 = vst [vmem:[#allocation5 + $0xcf] sm:$0xff] %v132_v16 }
  0x45   :  { %215 = vst [vmem:[#allocation5 + $0x117] sm:$0xff] %v132_v16 }
  0x46   :  { %168 = vst.msk [vmem:[#allocation5 + $0x47] sm:$0x1] %vm310_vm8, %v133_v17 }
  0x47   :  { %184 = vst.msk [vmem:[#allocation5 + $0x8f] sm:$0x1] %vm310_vm8, %v133_v17 }
  0x48   :  { %200 = vst.msk [vmem:[#allocation5 + $0xd7] sm:$0x1] %vm310_vm8, %v133_v17 }
  0x49   :  { %216 = vst.msk [vmem:[#allocation5 + $0x11f] sm:$0x1] %vm310_vm8, %v133_v17 }
  0x4a   :  { %220 = vsyncadd [#allocation4], 4464  ;;  %s223_s12 = sshll.u32 %s531_s1, 4  ;;  %s294_s13 = smov [#allocation5]   ;;  %s224_s12 = int_to_ptr.hbm [resolvable:$true] %s223_s12 }
  0x4b   :  { %s221_s14 = sshll.u32 %s294_s13, 4  ;;  %s295_s15 = smov 144   ;;  %s222_s14 = int_to_ptr.vmem [resolvable:$true] %s221_s14 }
  0x4c   :  { %s296_s16 = smov 9  }
  0x4d   :  { %229 = dma.vmem_to_hbm [thread:$0]  %s222_s14, 144, %s224_s12, [#allocation4], %s295_s15, %s295_s15, %s296_s16  }
  0x4e   :  { %291 = dma.done.wait [#allocation4], 4608  }
  0x4f   :  { %292 = vsyncadd [#allocation4], 4294962688 }
  0x50   :  { %234 = vsyncpa [#allocation3], 1 }
  0x51   :  { %235 = vsyncpa [#allocation4], 1 }

</bundles_post_ra>
